<compile_context>
chip_gen: v7x
topology: tpu7x:2x2x1
jax: 0.10.0
libtpu: 0.0.40
codegen_flags: <defaults>
</compile_context>

<pallas_src>
import jax
import jax.numpy as jnp
from jax.experimental import pallas as pl
from jax.experimental.pallas import tpu as pltpu

INPUT_DIM = 561
OUTPUT_DIM = 6
HIDDEN_DIM = 256
BN_EPS = 1e-5

IN_PAD = 640     # 561 -> next multiple of 128 (lane/MXU aligned K)
OUT_PAD = 128    # 6 -> lane-dense output width (unmasked vst)


def _round_up(n, m):
    return ((n + m - 1) // m) * m


def _ffn_kernel(x_ref, w1_ref, b1_ref, w2_ref, b2_ref, w3_ref, b3_ref, o_ref):
    # layer 1: Linear(640->256) with BN folded in, + ReLU (dropout = identity in eval)
    h = jnp.dot(x_ref[...], w1_ref[...], preferred_element_type=jnp.float32)
    h = jnp.maximum(h + b1_ref[...], 0.0).astype(jnp.bfloat16)
    # layer 2: Linear(256->256) with BN folded in, + ReLU
    h = jnp.dot(h, w2_ref[...], preferred_element_type=jnp.float32)
    h = jnp.maximum(h + b2_ref[...], 0.0).astype(jnp.bfloat16)
    # layer 3: Linear(256->128 padded); only the first 6 output columns are meaningful
    out = jnp.dot(h, w3_ref[...], preferred_element_type=jnp.float32) + b3_ref[...]
    o_ref[...] = out.astype(o_ref.dtype)


def _fold_bn(w, b, gamma, beta, mean, var):
    # BN(eval) is affine: y = (z - m) * g / sqrt(v+eps) + beta  ->  fold into W, b exactly.
    scale = gamma * jax.lax.rsqrt(var + BN_EPS)            # [1, out]
    return w * scale, (b - mean) * scale + beta            # [in, out], [1, out]


def prepare_params(params):
    """One-time preprocessing: fold BN, pad to MXU-friendly shapes, cast weights to bf16.

    Call once (outside the per-forward path) and reuse the result for every forward.
    """
    (w1, b1, g1, beta1, m1, v1,
     w2, b2, g2, beta2, m2, v2,
     w3, b3) = params

    w1f, b1f = _fold_bn(w1, b1, g1, beta1, m1, v1)
    w2f, b2f = _fold_bn(w2, b2, g2, beta2, m2, v2)

    # Pad K (561 -> 640) and output N (6 -> 128); zero padding is exact for the matmuls.
    w1p = jnp.zeros((IN_PAD, HIDDEN_DIM), jnp.bfloat16).at[:INPUT_DIM].set(
        w1f.astype(jnp.bfloat16))
    w2p = w2f.astype(jnp.bfloat16)
    w3p = jnp.zeros((HIDDEN_DIM, OUT_PAD), jnp.bfloat16).at[:, :OUTPUT_DIM].set(
        w3.astype(jnp.bfloat16))
    b3p = jnp.zeros((1, OUT_PAD), jnp.float32).at[:, :OUTPUT_DIM].set(b3)

    return (w1p, b1f.astype(jnp.float32),
            w2p, b2f.astype(jnp.float32),
            w3p, b3p)


def _pick_tiling(B, tile_b):
    """Pick (tile_b, padded_B). Small batches -> one 16-row-aligned tile; large batches ->
    256-multiple tiles with >=2 grid steps so both v7x TensorCores get work."""
    if B <= 256:
        tb = _round_up(max(B, 1), 16)      # bf16 packs 16 rows per sublane group
        return tb, tb
    Bp = _round_up(B, 256)
    tb = min(tile_b, max(256, (Bp // 2) // 256 * 256))   # >=2 grid steps when possible
    Bp = _round_up(Bp, tb)
    return tb, Bp


def simple_feed_forward(x, prepared_params, *, tile_b=512):
    """Forward pass. `prepared_params` must come from prepare_params (one-time)."""
    w1p, b1f, w2p, b2f, w3p, b3p = prepared_params

    B = x.shape[0]
    tb, Bp = _pick_tiling(B, tile_b)

    # Single padded bf16 copy of x (no intermediate fp32 padded buffer).
    xp = jnp.zeros((Bp, IN_PAD), jnp.bfloat16).at[:B, :INPUT_DIM].set(
        x.astype(jnp.bfloat16))

    grid = (Bp // tb,)

    def const2(i):
        return (0, 0)

    flops = 2 * Bp * (IN_PAD * HIDDEN_DIM + HIDDEN_DIM * HIDDEN_DIM + HIDDEN_DIM * OUT_PAD)
    bytes_accessed = (xp.size * 2
                      + w1p.size * 2 + w2p.size * 2 + w3p.size * 2
                      + (b1f.size + b2f.size + b3p.size) * 4
                      + Bp * OUT_PAD * 2)                  # bf16 output writeback

    # Weights/biases have constant block indices -> single buffer (no dead pipeline buf).
    resident = dict(pipeline_mode=pl.Buffered(1))

    out = pl.pallas_call(
        _ffn_kernel,
        out_shape=jax.ShapeDtypeStruct((Bp, OUT_PAD), jnp.bfloat16),
        grid_spec=pltpu.PrefetchScalarGridSpec(
            num_scalar_prefetch=0,
            grid=grid,
            in_specs=[
                pl.BlockSpec((tb, IN_PAD), lambda i: (i, 0)),                 # x (pipelined)
                pl.BlockSpec((IN_PAD, HIDDEN_DIM), const2, **resident),       # w1 (resident)
                pl.BlockSpec((1, HIDDEN_DIM), const2, **resident),            # b1
                pl.BlockSpec((HIDDEN_DIM, HIDDEN_DIM), const2, **resident),   # w2
                pl.BlockSpec((1, HIDDEN_DIM), const2, **resident),            # b2
                pl.BlockSpec((HIDDEN_DIM, OUT_PAD), const2, **resident),      # w3
                pl.BlockSpec((1, OUT_PAD), const2, **resident),               # b3
            ],
            out_specs=pl.BlockSpec((tb, OUT_PAD), lambda i: (i, 0)),
        ),
        compiler_params=pltpu.CompilerParams(
            dimension_semantics=("parallel",),
            vmem_limit_bytes=16 << 20,
        ),
        cost_estimate=pl.CostEstimate(
            flops=flops, transcendentals=0, bytes_accessed=bytes_accessed),
    )(xp, w1p, b1f, w2p, b2f, w3p, b3p)

    # Slice out the real rows/columns; upcast to fp32 for callers (tiny op).
    return out[:B, :OUTPUT_DIM].astype(jnp.float32)


def init_params(key, hidden_dim=HIDDEN_DIM):
    ks = jax.random.split(key, 6)

    def lin(kw, kb, fan_in, fan_out):
        bound = 1.0 / jnp.sqrt(fan_in)
        w = jax.random.uniform(kw, (fan_in, fan_out), jnp.float32, -bound, bound)
        b = jax.random.uniform(kb, (1, fan_out), jnp.float32, -bound, bound)
        return w, b

    w1, b1 = lin(ks[0], ks[1], INPUT_DIM, hidden_dim)
    w2, b2 = lin(ks[2], ks[3], hidden_dim, hidden_dim)
    w3, b3 = lin(ks[4], ks[5], hidden_dim, OUTPUT_DIM)

    # BatchNorm1d defaults: gamma=1, beta=0, running_mean=0, running_var=1
    g1 = jnp.ones((1, hidden_dim), jnp.float32)
    beta1 = jnp.zeros((1, hidden_dim), jnp.float32)
    m1 = jnp.zeros((1, hidden_dim), jnp.float32)
    v1 = jnp.ones((1, hidden_dim), jnp.float32)
    g2 = jnp.ones((1, hidden_dim), jnp.float32)
    beta2 = jnp.zeros((1, hidden_dim), jnp.float32)
    m2 = jnp.zeros((1, hidden_dim), jnp.float32)
    v2 = jnp.ones((1, hidden_dim), jnp.float32)

    return (w1, b1, g1, beta1, m1, v1,
            w2, b2, g2, beta2, m2, v2,
            w3, b3)


def reference_forward(x, params):
    (w1, b1, g1, beta1, m1, v1,
     w2, b2, g2, beta2, m2, v2,
     w3, b3) = params
    h = x @ w1 + b1
    h = (h - m1) * jax.lax.rsqrt(v1 + BN_EPS) * g1 + beta1
    h = jnp.maximum(h, 0.0)
    h = h @ w2 + b2
    h = (h - m2) * jax.lax.rsqrt(v2 + BN_EPS) * g2 + beta2
    h = jnp.maximum(h, 0.0)
    return h @ w3 + b3


if __name__ == "__main__":
    key = jax.random.PRNGKey(0)
    kx, kp = jax.random.split(key)
    B = 8
    x = jax.random.normal(kx, (B, INPUT_DIM), jnp.float32)
    params = init_params(kp)

    # One-time parameter preprocessing (BN fold + pad + bf16 cast), reused per forward.
    prepped = prepare_params(params)
    prepped = jax.block_until_ready(prepped)

    out = simple_feed_forward(x, prepped)
    out = jax.block_until_ready(out)

    ref = reference_forward(x, params)
    assert out.shape == (B, OUTPUT_DIM)
    # bf16 matmul operands (fp32 accumulation) -> looser tolerance than pure fp32.
    assert jnp.allclose(out, ref, atol=5e-2, rtol=5e-2), "mismatch vs reference"
    print("KERNEL_OK")
</pallas_src>

<mosaic_0001>
module attributes {stable_mosaic.version = 11 : i64} {
  func.func @_ffn_kernel(%arg0: i32, %arg1: memref<16x640xbf16, #tpu.memory_space<vmem>>, %arg2: memref<640x256xbf16, #tpu.memory_space<vmem>>, %arg3: memref<1x256xf32, #tpu.memory_space<vmem>>, %arg4: memref<256x256xbf16, #tpu.memory_space<vmem>>, %arg5: memref<1x256xf32, #tpu.memory_space<vmem>>, %arg6: memref<256x128xbf16, #tpu.memory_space<vmem>>, %arg7: memref<1x128xf32, #tpu.memory_space<vmem>>, %arg8: memref<16x128xbf16, #tpu.memory_space<vmem>>) attributes {dimension_semantics = [#tpu.dimension_semantics<parallel>], iteration_bounds = array<i64: 1>, scalar_prefetch = 0 : i64, scratch_operands = 0 : i64, tpu.core_type = #tpu.core_type<tc>, window_params = [{transform_indices = @transform_0, window_bounds = array<i64: 16, 640>}, {pipeline_mode = #tpu.pipeline_mode<synchronous>, transform_indices = @transform_1, window_bounds = array<i64: 640, 256>}, {pipeline_mode = #tpu.pipeline_mode<synchronous>, transform_indices = @transform_2, window_bounds = array<i64: 1, 256>}, {pipeline_mode = #tpu.pipeline_mode<synchronous>, transform_indices = @transform_3, window_bounds = array<i64: 256, 256>}, {pipeline_mode = #tpu.pipeline_mode<synchronous>, transform_indices = @transform_4, window_bounds = array<i64: 1, 256>}, {pipeline_mode = #tpu.pipeline_mode<synchronous>, transform_indices = @transform_5, window_bounds = array<i64: 256, 128>}, {pipeline_mode = #tpu.pipeline_mode<synchronous>, transform_indices = @transform_6, window_bounds = array<i64: 1, 128>}, {transform_indices = @transform_7, window_bounds = array<i64: 16, 128>}]} {
    %c0 = arith.constant 0 : index
    %c0_0 = arith.constant 0 : index
    %0 = vector.load %arg1[%c0, %c0_0] : memref<16x640xbf16, #tpu.memory_space<vmem>>, vector<16x640xbf16>
    %c0_1 = arith.constant 0 : index
    %c0_2 = arith.constant 0 : index
    %1 = vector.load %arg2[%c0_1, %c0_2] : memref<640x256xbf16, #tpu.memory_space<vmem>>, vector<640x256xbf16>
    %cst = arith.constant dense<0.000000e+00> : vector<16x256xf32>
    %2 = tpu.matmul %0, %1, %cst {dimension_numbers = #tpu.dot_dimension_numbers<[1], [0], [0], [1], [0, 0, 1, 1], [], []>} : vector<16x640xbf16>, vector<640x256xbf16>, vector<16x256xf32> -> vector<16x256xf32>
    %c0_3 = arith.constant 0 : index
    %c0_4 = arith.constant 0 : index
    %3 = vector.load %arg3[%c0_3, %c0_4] : memref<1x256xf32, #tpu.memory_space<vmem>>, vector<1x256xf32>
    %4 = vector.broadcast %3 : vector<1x256xf32> to vector<16x256xf32>
    %5 = arith.addf %2, %4 : vector<16x256xf32>
    %cst_5 = arith.constant 0.000000e+00 : f32
    %6 = vector.broadcast %cst_5 : f32 to vector<16x256xf32>
    %7 = arith.maximumf %5, %6 : vector<16x256xf32>
    %8 = arith.truncf %7 : vector<16x256xf32> to vector<16x256xbf16>
    %c0_6 = arith.constant 0 : index
    %c0_7 = arith.constant 0 : index
    %9 = vector.load %arg4[%c0_6, %c0_7] : memref<256x256xbf16, #tpu.memory_space<vmem>>, vector<256x256xbf16>
    %cst_8 = arith.constant dense<0.000000e+00> : vector<16x256xf32>
    %10 = tpu.matmul %8, %9, %cst_8 {dimension_numbers = #tpu.dot_dimension_numbers<[1], [0], [0], [1], [0, 0, 1, 1], [], []>} : vector<16x256xbf16>, vector<256x256xbf16>, vector<16x256xf32> -> vector<16x256xf32>
    %c0_9 = arith.constant 0 : index
    %c0_10 = arith.constant 0 : index
    %11 = vector.load %arg5[%c0_9, %c0_10] : memref<1x256xf32, #tpu.memory_space<vmem>>, vector<1x256xf32>
    %12 = vector.broadcast %11 : vector<1x256xf32> to vector<16x256xf32>
    %13 = arith.addf %10, %12 : vector<16x256xf32>
    %cst_11 = arith.constant 0.000000e+00 : f32
    %14 = vector.broadcast %cst_11 : f32 to vector<16x256xf32>
    %15 = arith.maximumf %13, %14 : vector<16x256xf32>
    %16 = arith.truncf %15 : vector<16x256xf32> to vector<16x256xbf16>
    %c0_12 = arith.constant 0 : index
    %c0_13 = arith.constant 0 : index
    %17 = vector.load %arg6[%c0_12, %c0_13] : memref<256x128xbf16, #tpu.memory_space<vmem>>, vector<256x128xbf16>
    %cst_14 = arith.constant dense<0.000000e+00> : vector<16x128xf32>
    %18 = tpu.matmul %16, %17, %cst_14 {dimension_numbers = #tpu.dot_dimension_numbers<[1], [0], [0], [1], [0, 0, 1, 1], [], []>} : vector<16x256xbf16>, vector<256x128xbf16>, vector<16x128xf32> -> vector<16x128xf32>
    %c0_15 = arith.constant 0 : index
    %c0_16 = arith.constant 0 : index
    %19 = vector.load %arg7[%c0_15, %c0_16] : memref<1x128xf32, #tpu.memory_space<vmem>>, vector<1x128xf32>
    %20 = vector.broadcast %19 : vector<1x128xf32> to vector<16x128xf32>
    %21 = arith.addf %18, %20 : vector<16x128xf32>
    %22 = arith.truncf %21 : vector<16x128xf32> to vector<16x128xbf16>
    %c0_17 = arith.constant 0 : index
    %c0_18 = arith.constant 0 : index
    %23 = vector.load %arg8[%c0_17, %c0_18] : memref<16x128xbf16, #tpu.memory_space<vmem>>, vector<16x128xbf16>
    tpu.vector_store %arg8[%c0_17, %c0_18], %22 {strides = array<i32>} : memref<16x128xbf16, #tpu.memory_space<vmem>>, vector<16x128xbf16>,
    return
  }
  func.func @transform_0(%arg0: i32) -> (i32, i32) {
    %c0_i32 = arith.constant 0 : i32
    %c0_i32_0 = arith.constant 0 : i32
    return %arg0, %c0_i32 : i32, i32
  }
  func.func @transform_1(%arg0: i32) -> (i32, i32) {
    %c0_i32 = arith.constant 0 : i32
    %c0_i32_0 = arith.constant 0 : i32
    %c0_i32_1 = arith.constant 0 : i32
    return %c0_i32, %c0_i32_0 : i32, i32
  }
  func.func @transform_2(%arg0: i32) -> (i32, i32) {
    %c0_i32 = arith.constant 0 : i32
    %c0_i32_0 = arith.constant 0 : i32
    %c0_i32_1 = arith.constant 0 : i32
    return %c0_i32, %c0_i32_0 : i32, i32
  }
  func.func @transform_3(%arg0: i32) -> (i32, i32) {
    %c0_i32 = arith.constant 0 : i32
    %c0_i32_0 = arith.constant 0 : i32
    %c0_i32_1 = arith.constant 0 : i32
    return %c0_i32, %c0_i32_0 : i32, i32
  }
  func.func @transform_4(%arg0: i32) -> (i32, i32) {
    %c0_i32 = arith.constant 0 : i32
    %c0_i32_0 = arith.constant 0 : i32
    %c0_i32_1 = arith.constant 0 : i32
    return %c0_i32, %c0_i32_0 : i32, i32
  }
  func.func @transform_5(%arg0: i32) -> (i32, i32) {
    %c0_i32 = arith.constant 0 : i32
    %c0_i32_0 = arith.constant 0 : i32
    %c0_i32_1 = arith.constant 0 : i32
    return %c0_i32, %c0_i32_0 : i32, i32
  }
  func.func @transform_6(%arg0: i32) -> (i32, i32) {
    %c0_i32 = arith.constant 0 : i32
    %c0_i32_0 = arith.constant 0 : i32
    %c0_i32_1 = arith.constant 0 : i32
    return %c0_i32, %c0_i32_0 : i32, i32
  }
  func.func @transform_7(%arg0: i32) -> (i32, i32) {
    %c0_i32 = arith.constant 0 : i32
    %c0_i32_0 = arith.constant 0 : i32
    return %arg0, %c0_i32 : i32, i32
  }
}

</mosaic_0001>

<bundles_post_ra>
// kernel: tpu_custom_call.1
= control target key start
LH: loop header
LB: loop body
LE: loop exit
PB: predicated region body
PF: predicated region fallthrough
CT: control target
= control target key end

     0   :  { %12 = vsyncpa [#allocation3], 0  ;;  %s1838_s0 = inlined_call_operand.hbm [shape: bf16[16,640], index: 0, kind: input, shape index: {}]   ;;  %s1839_s1 = inlined_call_operand.hbm [shape: bf16[640,256], index: 1, kind: input, shape index: {}]   ;;  %s1840_s2 = inlined_call_operand.vmem [shape: f32[1,256], index: 2, kind: input, shape index: {}]   ;;  %s1841_s3 = inlined_call_operand.hbm [shape: bf16[256,256], index: 3, kind: input, shape index: {}]   ;;  %s1842_s4 = inlined_call_operand.vmem [shape: f32[1,256], index: 4, kind: input, shape index: {}]   ;;  %s1843_s5 = inlined_call_operand.hbm [shape: bf16[256,128], index: 5, kind: input, shape index: {}]   ;;  %s1844_s6 = inlined_call_operand.vmem [shape: f32[1,128], index: 6, kind: input, shape index: {}]   ;;  %s1845_s7 = inlined_call_operand.hbm [shape: bf16[16,128], index: 7, kind: output, shape index: {}]  }
   0x1   :  { %13 = vsyncpa [#allocation6], 0 }
   0x2   :  { %14 = vsyncpa [#allocation9], 0 }
   0x3   :  { %15 = vsyncpa [#allocation4], 0  ;;  %s1698_s24 = smov [#allocation5]   ;;  %s1580_s28 = scalar_lea.hbm %s1839_s1, 10240 }
   0x4   :  { %s33_s25 = sshll.u32 %s1698_s24, 4  ;;  %p1581_p0 = scmp.ne.s32.totalorder %s1839_s1, %s1580_s28  ;;  %s34_s25 = int_to_ptr.vmem [resolvable:$true] %s33_s25 }
   0x5   :  { %p1584_p1 = scmp.lt.u32.totalorder %s1580_s28, %s1839_s1 }
   0x7   :  { %p1586_p2 = pnand %p1584_p1, %p1581_p0 }
   0x9   :  { %1589 = shalt.err (!%p1586_p2)
}
   0xa   :  { %s1590_s10 = scalar_lea.vmem %s34_s25, 10240  ;;  %p1595_p4 = scmp.lt.s32.totalorder %s34_s25, %s34_s25 }
   0xb   :  { %p1591_p3 = scmp.ne.s32.totalorder %s34_s25, %s1590_s10  ;;  %p1596_p5 = scmp.lt.s32.totalorder %s1590_s10, %s1590_s10 }
   0xd   :  { %p1597_p6 = por %p1596_p5, %p1595_p4 }
   0xf   :  { %p1598_p7 = pnand %p1597_p6, %p1591_p3 }
  0x11   :  { %1601 = shalt.err (!%p1598_p7)
}
  0x12   :  { %s1699_s11 = smov 128   ;;  %s1700_s12 = smov 8  }
  0x13   :  { %39 = dma.hbm_to_vmem [thread:$0]  %s1839_s1, 10240, %s34_s25, [#allocation6], %s1699_s11, %s1699_s11, %s1700_s12  }
  0x14   :  { %s1701_s15 = smov [#allocation2]   ;;  %s1602_s19 = scalar_lea.hbm %s1838_s0, 640 }
  0x15   :  { %s21_s16 = sshll.u32 %s1701_s15, 4  ;;  %p1603_p8 = scmp.ne.s32.totalorder %s1838_s0, %s1602_s19  ;;  %s22_s16 = int_to_ptr.vmem [resolvable:$true] %s21_s16 }
  0x16   :  { %p1606_p9 = scmp.lt.u32.totalorder %s1602_s19, %s1838_s0 }
  0x18   :  { %p1608_p10 = pnand %p1606_p9, %p1603_p8 }
  0x1a   :  { %1611 = shalt.err (!%p1608_p10)
}
  0x1b   :  { %s1612_s24 = scalar_lea.vmem %s22_s16, 640  ;;  %p1617_p12 = scmp.lt.s32.totalorder %s22_s16, %s22_s16 }
  0x1c   :  { %p1613_p11 = scmp.ne.s32.totalorder %s22_s16, %s1612_s24  ;;  %p1618_p13 = scmp.lt.s32.totalorder %s1612_s24, %s1612_s24 }
  0x1e   :  { %p1619_p0 = por %p1618_p13, %p1617_p12 }
  0x20   :  { %p1620_p1 = pnand %p1619_p0, %p1613_p11 }
  0x22   :  { %1623 = shalt.err (!%p1620_p1)
}
  0x23   :  { %s1702_s1 = smov 320   ;;  %s1703_s25 = smov 20  }
  0x24   :  { %27 = dma.hbm_to_vmem [thread:$0]  %s1838_s0, 640, %s22_s16, [#allocation3], %s1702_s1, %s1702_s1, %s1703_s25  }
  0x25   :  { %s1704_s28 = smov [#allocation7]   ;;  %s1705_s30 = smov [#allocation8]  }
  0x26   :  { %s47_s29 = sshll.u32 %s1704_s28, 4  ;;  %s61_s8 = sshll.u32 %s1705_s30, 4  ;;  %s48_s29 = int_to_ptr.vmem [resolvable:$true] %s47_s29  ;;  %s1777_s8 = int_to_ptr.vmem [resolvable:$true] %s61_s8 }
  0x27   :  { %s1624_s13 = scalar_lea.hbm %s1841_s3, 4096 }
  0x28   :  { %p1625_p2 = scmp.ne.s32.totalorder %s1841_s3, %s1624_s13  ;;  %p1628_p3 = scmp.lt.u32.totalorder %s1624_s13, %s1841_s3 }
  0x2a   :  { %p1630_p4 = pnand %p1628_p3, %p1625_p2 }
  0x2c   :  { %1633 = shalt.err (!%p1630_p4)
}
  0x2d   :  { %s1634_s0 = scalar_lea.vmem %s48_s29, 4096  ;;  %p1639_p6 = scmp.lt.s32.totalorder %s48_s29, %s48_s29 }
  0x2e   :  { %p1635_p5 = scmp.ne.s32.totalorder %s48_s29, %s1634_s0  ;;  %p1640_p7 = scmp.lt.s32.totalorder %s1634_s0, %s1634_s0 }
  0x30   :  { %p1641_p8 = por %p1640_p7, %p1639_p6 }
  0x32   :  { %p1642_p9 = pnand %p1641_p8, %p1635_p5 }
  0x34   :  { %1645 = shalt.err (!%p1642_p9)
}
  0x35   :  { %53 = dma.hbm_to_vmem [thread:$0]  %s1841_s3, 4096, %s48_s29, [#allocation6], %s1699_s11, %s1699_s11, %s1700_s12  }
  0x36   :  { %s1646_s22 = scalar_lea.hbm %s1843_s5, 2048 }
  0x37   :  { %p1647_p10 = scmp.ne.s32.totalorder %s1843_s5, %s1646_s22  ;;  %p1650_p11 = scmp.lt.u32.totalorder %s1646_s22, %s1843_s5 }
  0x39   :  { %p1652_p12 = pnand %p1650_p11, %p1647_p10 }
  0x3b   :  { %1655 = shalt.err (!%p1652_p12)
}
  0x3c   :  { %s1656_s26 = scalar_lea.vmem %s1777_s8, 2048  ;;  %p1661_p0 = scmp.lt.s32.totalorder %s1777_s8, %s1777_s8 }
  0x3d   :  { %p1657_p13 = scmp.ne.s32.totalorder %s1777_s8, %s1656_s26  ;;  %p1662_p1 = scmp.lt.s32.totalorder %s1656_s26, %s1656_s26 }
  0x3f   :  { %p1663_p2 = por %p1662_p1, %p1661_p0 }
  0x41   :  { %p1664_p3 = pnand %p1663_p2, %p1657_p13 }
  0x43   :  { %1667 = shalt.err (!%p1664_p3)
}
  0x44   :  { %s1706_s3 = smov 64   ;;  %s1707_s11 = smov 4  }
  0x45   :  { %67 = dma.hbm_to_vmem [thread:$0]  %s1843_s5, 2048, %s1777_s8, [#allocation9], %s1706_s3, %s1706_s3, %s1707_s11  }
  0x46   :  { %1690 = dma.done.wait [#allocation3], 640  }
  0x47   :  { %1691 = vsyncadd [#allocation3], 4294966656 }
  0x48   :  { %1692 = dma.done.wait [#allocation6], 14336  }
  0x49   :  { %1693 = vsyncadd [#allocation6], 4294952960 }
  0x4a   :  { %1694 = dma.done.wait [#allocation9], 2048  }
  0x4b   :  { %1695 = vsyncadd [#allocation9], 4294965248  ;;  %v1389_v0 = vld [vmem:[#allocation5 + $0x4] ss:$8 sps:$4 sm:$0xff]   ;;  %v1708_v1 = vmov 0   ;;  %s1709_s8 = smov [#allocation10]  }
  0x4c   :  { %725 = vmatprep.mubr.bf16.mxu1 %v1708_v1  ;;  %v1391_v2 = vld [vmem:[#allocation5] ss:$8 sps:$4 sm:$0xff]   ;;  %607 = vmatprep.subr.bf16.mxu0 %v1389_v0  ;;  %v1392_v3 = vld [vmem:[#allocation5 + $0x14] ss:$8 sps:$4 sm:$0xff]   ;;  %v1394_v4 = vld [vmem:[#allocation5 + $0x10] ss:$8 sps:$4 sm:$0xff]  }
  0x4d   :  { %608 = vmatpush1.bf16.msra.mxu0 %v1391_v2  ;;  %v1395_v5 = vld [vmem:[#allocation5 + $0x24] ss:$8 sps:$4 sm:$0xff]   ;;  %v1397_v6 = vld [vmem:[#allocation5 + $0x20] ss:$8 sps:$4 sm:$0xff]   ;;  %v1398_v7 = vld [vmem:[#allocation5 + $0x34] ss:$8 sps:$4 sm:$0xff]  }
  0x4e   :  { %609 = vmatprep.subr.bf16.mxu0 %v1392_v3  ;;  %v1400_v8 = vld [vmem:[#allocation5 + $0x30] ss:$8 sps:$4 sm:$0xff]   ;;  %v1401_v9 = vld [vmem:[#allocation5 + $0x44] ss:$8 sps:$4 sm:$0xff]   ;;  %v1403_v10 = vld [vmem:[#allocation5 + $0x40] ss:$8 sps:$4 sm:$0xff]  }
  0x4f   :  { %v1404_v11 = vld [vmem:[#allocation5 + $0x54] ss:$8 sps:$4 sm:$0xff]   ;;  %v1406_v12 = vld [vmem:[#allocation5 + $0x50] ss:$8 sps:$4 sm:$0xff]   ;;  %v1407_v13 = vld [vmem:[#allocation5 + $0x64] ss:$8 sps:$4 sm:$0xff]  }
  0x50   :  { %v1439_v14 = vld [vmem:[#allocation2 + $0x4] ss:$20 sps:$4 sm:$0xff]   ;;  %v1409_v15 = vld [vmem:[#allocation5 + $0x60] ss:$8 sps:$4 sm:$0xff]   ;;  %v1413_v18 = vld [vmem:[#allocation5 + $0x84] ss:$8 sps:$4 sm:$0xff]  }
  0x51   :  { %610 = vmatpush1.bf16.msra.mxu0 %v1394_v4  ;;  %v1410_v16 = vld [vmem:[#allocation5 + $0x74] ss:$8 sps:$4 sm:$0xff]   ;;  %639 = vmatprep.mubr.bf16.mxu0 %v1439_v14  ;;  %v1412_v17 = vld [vmem:[#allocation5 + $0x70] ss:$8 sps:$4 sm:$0xff]   ;;  %v1415_v19 = vld [vmem:[#allocation5 + $0x80] ss:$8 sps:$4 sm:$0xff]  }
  0x52   :  { %611 = vmatprep.subr.bf16.mxu0 %v1395_v5  ;;  %v1416_v20 = vld [vmem:[#allocation5 + $0x94] ss:$8 sps:$4 sm:$0xff]   ;;  %v1464_v21 = vld [vmem:[#allocation5 + $0x204] ss:$8 sps:$4 sm:$0xff]   ;;  %v1418_v22 = vld [vmem:[#allocation5 + $0x90] ss:$8 sps:$4 sm:$0xff]  }
  0x53   :  { %v1419_v23 = vld [vmem:[#allocation5 + $0xa4] ss:$8 sps:$4 sm:$0xff]   ;;  %v1469_v24 = vld [vmem:[#allocation5 + $0x200] ss:$8 sps:$4 sm:$0xff]   ;;  %693 = vmatprep.subr.bf16.mxu1 %v1464_v21  ;;  %v1470_v25 = vld [vmem:[#allocation5 + $0x214] ss:$8 sps:$4 sm:$0xff]  }
  0x54   :  { %694 = vmatpush1.bf16.msra.mxu1 %v1469_v24  ;;  %v1421_v26 = vld [vmem:[#allocation5 + $0xa0] ss:$8 sps:$4 sm:$0xff]   ;;  %v1475_v27 = vld [vmem:[#allocation5 + $0x210] ss:$8 sps:$4 sm:$0xff]   ;;  %v1476_v28 = vld [vmem:[#allocation5 + $0x224] ss:$8 sps:$4 sm:$0xff]  }
  0x55   :  { %612 = vmatpush1.bf16.msra.mxu0 %v1397_v6  ;;  %695 = vmatprep.subr.bf16.mxu1 %v1470_v25  ;;  %v1422_v29 = vld [vmem:[#allocation5 + $0xb4] ss:$8 sps:$4 sm:$0xff]   ;;  %v1481_v30 = vld [vmem:[#allocation5 + $0x220] ss:$8 sps:$4 sm:$0xff]   ;;  %v1424_v32 = vld [vmem:[#allocation5 + $0xb0] ss:$8 sps:$4 sm:$0xff]  }
  0x56   :  { %613 = vmatprep.subr.bf16.mxu0 %v1398_v7  ;;  %v1482_v31 = vld [vmem:[#allocation5 + $0x234] ss:$8 sps:$4 sm:$0xff]   ;;  %v1425_v33 = vld [vmem:[#allocation5 + $0xc4] ss:$8 sps:$4 sm:$0xff]   ;;  %v1487_v34 = vld [vmem:[#allocation5 + $0x230] ss:$8 sps:$4 sm:$0xff]  }
  0x57   :  { %v1488_v35 = vld [vmem:[#allocation5 + $0x244] ss:$8 sps:$4 sm:$0xff]   ;;  %v1427_v36 = vld [vmem:[#allocation5 + $0xc0] ss:$8 sps:$4 sm:$0xff]   ;;  %v1428_v37 = vld [vmem:[#allocation5 + $0xd4] ss:$8 sps:$4 sm:$0xff]  }
  0x58   :  { %696 = vmatpush1.bf16.msra.mxu1 %v1475_v27  ;;  %v1493_v38 = vld [vmem:[#allocation5 + $0x240] ss:$8 sps:$4 sm:$0xff]   ;;  %v1494_v39 = vld [vmem:[#allocation5 + $0x254] ss:$8 sps:$4 sm:$0xff]   ;;  %v1430_v40 = vld [vmem:[#allocation5 + $0xd0] ss:$8 sps:$4 sm:$0xff]  }
  0x59   :  { %614 = vmatpush1.bf16.msra.mxu0 %v1400_v8  ;;  %697 = vmatprep.subr.bf16.mxu1 %v1476_v28  ;;  %v1431_v41 = vld [vmem:[#allocation5 + $0xe4] ss:$8 sps:$4 sm:$0xff]   ;;  %v1499_v42 = vld [vmem:[#allocation5 + $0x250] ss:$8 sps:$4 sm:$0xff]   ;;  %v1433_v44 = vld [vmem:[#allocation5 + $0xe0] ss:$8 sps:$4 sm:$0xff]  }
  0x5a   :  { %615 = vmatprep.subr.bf16.mxu0 %v1401_v9  ;;  %v1500_v43 = vld [vmem:[#allocation5 + $0x264] ss:$8 sps:$4 sm:$0xff]   ;;  %v1434_v45 = vld [vmem:[#allocation5 + $0xf4] ss:$8 sps:$4 sm:$0xff]   ;;  %v1505_v46 = vld [vmem:[#allocation5 + $0x260] ss:$8 sps:$4 sm:$0xff]  }
  0x5b   :  { %v1506_v47 = vld [vmem:[#allocation5 + $0x274] ss:$8 sps:$4 sm:$0xff]   ;;  %v1436_v48 = vld [vmem:[#allocation5 + $0xf0] ss:$8 sps:$4 sm:$0xff]   ;;  %v1442_v50 = vld [vmem:[#allocation5 + $0x104] ss:$8 sps:$4 sm:$0xff]  }
  0x5c   :  { %698 = vmatpush1.bf16.msra.mxu1 %v1481_v30  ;;  %v1437_v49 = vld [vmem:[#allocation2] ss:$20 sps:$4 sm:$0xff]   ;;  %v1440_v53 = vld [vmem:[#allocation5 + $0x100] ss:$8 sps:$4 sm:$0xff]   ;;  %v1445_v55 = vld [vmem:[#allocation5 + $0x114] ss:$8 sps:$4 sm:$0xff]  }
  0x5d   :  { %616 = vmatpush1.bf16.msra.mxu0 %v1403_v10  ;;  %699 = vmatprep.subr.bf16.mxu1 %v1482_v31  ;;  %v1511_v51 = vld [vmem:[#allocation5 + $0x270] ss:$8 sps:$4 sm:$0xff]   ;;  %v1518_v52 = vld [vmem:[#allocation7 + $0x4] ss:$8 sps:$4 sm:$0xff]   ;;  %v1515_v56 = vld [vmem:[#allocation2 + $0x10] ss:$20 sps:$4 sm:$0xff]  }
  0x5e   :  { %617 = vmatprep.subr.bf16.mxu0 %v1404_v11  ;;  %v1514_v54 = vld [vmem:[#allocation2 + $0xc] ss:$20 sps:$4 sm:$0xff]   ;;  %v1516_v57 = vld [vmem:[#allocation7] ss:$8 sps:$4 sm:$0xff]   ;;  %v1521_v58 = vld [vmem:[#allocation7 + $0x14] ss:$8 sps:$4 sm:$0xff]  }
  0x5f   :  { %v1443_v59 = vld [vmem:[#allocation5 + $0x110] ss:$8 sps:$4 sm:$0xff]   ;;  %v1448_v60 = vld [vmem:[#allocation5 + $0x124] ss:$8 sps:$4 sm:$0xff]   ;;  %v1446_v63 = vld [vmem:[#allocation5 + $0x120] ss:$8 sps:$4 sm:$0xff]  }
  0x60   :  { %700 = vmatpush1.bf16.msra.mxu1 %v1487_v34  ;;  %v1519_v61 = vld [vmem:[#allocation7 + $0x10] ss:$8 sps:$4 sm:$0xff]   ;;  %v1524_v62 = vld [vmem:[#allocation7 + $0x24] ss:$8 sps:$4 sm:$0xff]   ;;  %v1451_v0 = vld [vmem:[#allocation5 + $0x134] ss:$8 sps:$4 sm:$0xff]  }
  0x61   :  { %618 = vmatpush1.bf16.msra.mxu0 %v1406_v12  ;;  %701 = vmatprep.subr.bf16.mxu1 %v1488_v35  ;;  %v1449_v1 = vld [vmem:[#allocation5 + $0x130] ss:$8 sps:$4 sm:$0xff]   ;;  %v1522_v2 = vld [vmem:[#allocation7 + $0x20] ss:$8 sps:$4 sm:$0xff]   ;;  %v1454_v3 = vld [vmem:[#allocation5 + $0x144] ss:$8 sps:$4 sm:$0xff]  }
  0x62   :  { %619 = vmatprep.subr.bf16.mxu0 %v1407_v13  ;;  %v1527_v4 = vld [vmem:[#allocation7 + $0x34] ss:$8 sps:$4 sm:$0xff]   ;;  %v1525_v5 = vld [vmem:[#allocation7 + $0x30] ss:$8 sps:$4 sm:$0xff]   ;;  %v1530_v6 = vld [vmem:[#allocation7 + $0x44] ss:$8 sps:$4 sm:$0xff]  }
  0x63   :  { %v1452_v7 = vld [vmem:[#allocation5 + $0x140] ss:$8 sps:$4 sm:$0xff]   ;;  %v1457_v8 = vld [vmem:[#allocation5 + $0x154] ss:$8 sps:$4 sm:$0xff]   ;;  %v1455_v11 = vld [vmem:[#allocation5 + $0x150] ss:$8 sps:$4 sm:$0xff]  }
  0x64   :  { %702 = vmatpush1.bf16.msra.mxu1 %v1493_v38  ;;  %v1528_v9 = vld [vmem:[#allocation7 + $0x40] ss:$8 sps:$4 sm:$0xff]   ;;  %v1533_v10 = vld [vmem:[#allocation7 + $0x54] ss:$8 sps:$4 sm:$0xff]   ;;  %v1460_v12 = vld [vmem:[#allocation5 + $0x164] ss:$8 sps:$4 sm:$0xff]  }
  0x65   :  { %620 = vmatpush1.bf16.msra.mxu0 %v1409_v15  ;;  %703 = vmatprep.subr.bf16.mxu1 %v1494_v39  ;;  %v1531_v13 = vld [vmem:[#allocation7 + $0x50] ss:$8 sps:$4 sm:$0xff]   ;;  %v1536_v14 = vld [vmem:[#allocation7 + $0x64] ss:$8 sps:$4 sm:$0xff]   ;;  %v1458_v15 = vld [vmem:[#allocation5 + $0x160] ss:$8 sps:$4 sm:$0xff]  }
  0x66   :  { %621 = vmatprep.subr.bf16.mxu0 %v1410_v16  ;;  %v1463_v16 = vld [vmem:[#allocation5 + $0x174] ss:$8 sps:$4 sm:$0xff]   ;;  %v1537_v21 = vld [vmem:[#allocation7 + $0x70] ss:$8 sps:$4 sm:$0xff]   ;;  %v1540_v25 = vld [vmem:[#allocation7 + $0x80] ss:$8 sps:$4 sm:$0xff]  }
  0x67   :  { %v1474_v24 = vld [vmem:[#allocation5 + $0x194] ss:$8 sps:$4 sm:$0xff]   ;;  %v1472_v27 = vld [vmem:[#allocation5 + $0x190] ss:$8 sps:$4 sm:$0xff]   ;;  %v1480_v28 = vld [vmem:[#allocation5 + $0x1a4] ss:$8 sps:$4 sm:$0xff]  }
  0x68   :  { %704 = vmatpush1.bf16.msra.mxu1 %v1499_v42  ;;  %v1548_v30 = vld [vmem:[#allocation7 + $0xa4] ss:$8 sps:$4 sm:$0xff]   ;;  %v1478_v31 = vld [vmem:[#allocation5 + $0x1a0] ss:$8 sps:$4 sm:$0xff]   ;;  %v1551_v34 = vld [vmem:[#allocation7 + $0xb4] ss:$8 sps:$4 sm:$0xff]  }
  0x69   :  { %622 = vmatpush1.bf16.msra.mxu0 %v1412_v17  ;;  %705 = vmatprep.subr.bf16.mxu1 %v1500_v43  ;;  %v1534_v17 = vld [vmem:[#allocation7 + $0x60] ss:$8 sps:$4 sm:$0xff]   ;;  %v1484_v35 = vld [vmem:[#allocation5 + $0x1b0] ss:$8 sps:$4 sm:$0xff]   ;;  %v1554_v38 = vld [vmem:[#allocation7 + $0xc4] ss:$8 sps:$4 sm:$0xff]  }
  0x6a   :  { %623 = vmatprep.subr.bf16.mxu0 %v1413_v18  ;;  %v1539_v18 = vld [vmem:[#allocation7 + $0x74] ss:$8 sps:$4 sm:$0xff]   ;;  %v1490_v39 = vld [vmem:[#allocation5 + $0x1c0] ss:$8 sps:$4 sm:$0xff]   ;;  %v1496_v42 = vld [vmem:[#allocation5 + $0x1d0] ss:$8 sps:$4 sm:$0xff]  }
  0x6b   :  { %v1504_v43 = vld [vmem:[#allocation5 + $0x1e4] ss:$8 sps:$4 sm:$0xff]   ;;  %s1186_s9 = sshll.u32 %s1709_s8, 4  ;;  %s1187_s9 = int_to_ptr.vmem [resolvable:$true] %s1186_s9 }
  0x6c   :  { %706 = vmatpush1.bf16.msra.mxu1 %v1505_v46  ;;  %v1508_v46 = vld [vmem:[#allocation5 + $0x1f0] ss:$8 sps:$4 sm:$0xff]   ;;  %s1668_s10 = scalar_lea.vmem %s1187_s9, 128  ;;  %p1673_p5 = scmp.lt.s32.totalorder %s1187_s9, %s1187_s9 }
  0x6d   :  { %624 = vmatpush1.bf16.msra.mxu0 %v1415_v19  ;;  %707 = vmatprep.subr.bf16.mxu1 %v1506_v47  ;;  %v1461_v19 = vld [vmem:[#allocation5 + $0x170] ss:$8 sps:$4 sm:$0xff]   ;;  %v1512_v47 = vld [vmem:[#allocation2 + $0x8] ss:$20 sps:$4 sm:$0xff]   ;;  %p1669_p4 = scmp.ne.s32.totalorder %s1187_s9, %s1668_s10  ;;  %p1674_p6 = scmp.lt.s32.totalorder %s1668_s10, %s1668_s10 }
  0x6e   :  { %625 = vmatprep.subr.bf16.mxu0 %v1416_v20  ;;  %v1468_v20 = vld [vmem:[#allocation5 + $0x184] ss:$8 sps:$4 sm:$0xff]  }
  0x6f   :  { %p1675_p7 = por %p1674_p6, %p1673_p5 }
  0x70   :  { %708 = vmatpush1.bf16.msra.mxu1 %v1511_v51  ;;  %v1558_v51 = vld [vmem:[#allocation7 + $0xe0] ss:$8 sps:$4 sm:$0xff]  }
  0x71   :  { %626 = vmatpush1.bf16.msra.mxu0 %v1418_v22  ;;  %946 = vmatprep.subr.bf16.mxu1 %v1518_v52  ;;  %v1542_v22 = vld [vmem:[#allocation7 + $0x84] ss:$8 sps:$4 sm:$0xff]   ;;  %v1563_v52 = vld [vmem:[#allocation7 + $0xf4] ss:$8 sps:$4 sm:$0xff]   ;;  %p1676_p8 = pnand %p1675_p7, %p1669_p4 }
  0x72   :  { %627 = vmatprep.subr.bf16.mxu0 %v1419_v23  ;;  %v1466_v23 = vld [vmem:[#allocation5 + $0x180] ss:$8 sps:$4 sm:$0xff]  }
  0x73   :  { %726 = vmatmul.mubr.bf16.vlgmr.msra.gmra.mrb[0].mxu1 %v1515_v56 }
  0x74   :  { %947 = vmatpush1.bf16.msra.mxu1 %v1516_v57 }
  0x75   :  { %628 = vmatpush1.bf16.msra.mxu0 %v1421_v26  ;;  %948 = vmatprep.subr.bf16.mxu1 %v1521_v58  ;;  %v1545_v26 = vld [vmem:[#allocation7 + $0x94] ss:$8 sps:$4 sm:$0xff]  }
  0x76   :  { %629 = vmatprep.subr.bf16.mxu0 %v1422_v29  ;;  %v1543_v29 = vld [vmem:[#allocation7 + $0x90] ss:$8 sps:$4 sm:$0xff]  }
  0x78   :  { %949 = vmatpush1.bf16.msra.mxu1 %v1519_v61 }
  0x79   :  { %630 = vmatpush1.bf16.msra.mxu0 %v1424_v32  ;;  %950 = vmatprep.subr.bf16.mxu1 %v1524_v62  ;;  %v1486_v32 = vld [vmem:[#allocation5 + $0x1b4] ss:$8 sps:$4 sm:$0xff]   ;;  %v169_v62 = vld [vmem:[%s1840_s2] sm:$0x3] }
  0x7a   :  { %631 = vmatprep.subr.bf16.mxu0 %v1425_v33  ;;  %v1546_v33 = vld [vmem:[#allocation7 + $0xa0] ss:$8 sps:$4 sm:$0xff]  }
  0x7c   :  { %951 = vmatpush1.bf16.msra.mxu1 %v1522_v2 }
  0x7d   :  { %632 = vmatpush1.bf16.msra.mxu0 %v1427_v36  ;;  %952 = vmatprep.subr.bf16.mxu1 %v1527_v4  ;;  %v1492_v36 = vld [vmem:[#allocation5 + $0x1c4] ss:$8 sps:$4 sm:$0xff]  }
  0x7e   :  { %633 = vmatprep.subr.bf16.mxu0 %v1428_v37  ;;  %v1549_v37 = vld [vmem:[#allocation7 + $0xb0] ss:$8 sps:$4 sm:$0xff]  }
  0x80   :  { %953 = vmatpush1.bf16.msra.mxu1 %v1525_v5 }
  0x81   :  { %634 = vmatpush1.bf16.msra.mxu0 %v1430_v40  ;;  %954 = vmatprep.subr.bf16.mxu1 %v1530_v6  ;;  %v1498_v40 = vld [vmem:[#allocation5 + $0x1d4] ss:$8 sps:$4 sm:$0xff]  }
  0x82   :  { %635 = vmatprep.subr.bf16.mxu0 %v1431_v41  ;;  %v1552_v41 = vld [vmem:[#allocation7 + $0xc0] ss:$8 sps:$4 sm:$0xff]  }
  0x84   :  { %955 = vmatpush1.bf16.msra.mxu1 %v1528_v9 }
  0x85   :  { %636 = vmatpush1.bf16.msra.mxu0 %v1433_v44  ;;  %956 = vmatprep.subr.bf16.mxu1 %v1533_v10  ;;  %v1502_v44 = vld [vmem:[#allocation5 + $0x1e0] ss:$8 sps:$4 sm:$0xff]  }
  0x86   :  { %637 = vmatprep.subr.bf16.mxu0 %v1434_v45  ;;  %v1510_v45 = vld [vmem:[#allocation5 + $0x1f4] ss:$8 sps:$4 sm:$0xff]  }
  0x88   :  { %957 = vmatpush1.bf16.msra.mxu1 %v1531_v13 }
  0x89   :  { %638 = vmatpush1.bf16.msra.mxu0 %v1436_v48  ;;  %958 = vmatprep.subr.bf16.mxu1 %v1536_v14  ;;  %v1557_v48 = vld [vmem:[#allocation7 + $0xd4] ss:$8 sps:$4 sm:$0xff]  }
  0x8a   :  { %650 = vmatprep.subr.bf16.mxu0 %v1442_v50  ;;  %v1560_v50 = vld [vmem:[#allocation7 + $0xe4] ss:$8 sps:$4 sm:$0xff]  }
  0x8c   :  { %640 = vmatmul.mubr.bf16.vlgmr.msra.gmra.mrb[0].mxu0 %v1437_v49  ;;  %959 = vmatpush1.bf16.msra.mxu1 %v1534_v17  ;;  %v1555_v49 = vld [vmem:[#allocation7 + $0xd0] ss:$8 sps:$4 sm:$0xff]  }
  0x8d   :  { %651 = vmatpush1.bf16.msra.mxu0 %v1440_v53  ;;  %682 = vmatprep.mubr.bf16.mxu0 %v1514_v54  ;;  %v1561_v53 = vld [vmem:[#allocation7 + $0xf0] ss:$8 sps:$4 sm:$0xff]   ;;  %v1564_v54 = vld [vmem:[#allocation8 + $0x40] sm:$0xff]  }
  0x8e   :  { %652 = vmatprep.subr.bf16.mxu0 %v1445_v55  ;;  %960 = vmatprep.subr.bf16.mxu1 %v1539_v18 }
  0x90   :  { %961 = vmatpush1.bf16.msra.mxu1 %v1537_v21  ;;  %v1566_v21 = vld [vmem:[#allocation8 + $0x48] sm:$0xff]  }
  0x91   :  { %653 = vmatpush1.bf16.msra.mxu0 %v1443_v59  ;;  %962 = vmatprep.subr.bf16.mxu1 %v1542_v22  ;;  %v171_v59 = vlaneseq  ;;  %v1567_v22 = vld [vmem:[#allocation8 + $0x8] sm:$0xff]  }
  0x92   :  { %654 = vmatprep.subr.bf16.mxu0 %v1448_v60 }
  0x93   :  { %v172_v60 = vshrl.u32 %v171_v59, 7 }
  0x94   :  { %963 = vmatpush1.bf16.msra.mxu1 %v1540_v25  ;;  %v1570_v25 = vld [vmem:[#allocation8 + $0x58] sm:$0xff]  }
  0x95   :  { %655 = vmatpush1.bf16.msra.mxu0 %v1446_v63  ;;  %964 = vmatprep.subr.bf16.mxu1 %v1545_v26  ;;  %v173_v61 = vsub.s32 0, %v172_v60  ;;  %v177_v63 = vsub.s32 1, %v172_v60  ;;  %v1571_v26 = vld [vmem:[#allocation8 + $0x18] sm:$0xff]  }
  0x96   :  { %656 = vmatprep.subr.bf16.mxu0 %v1451_v0 }
  0x97   :  { %v174_v0 = vrot.slane %v169_v62, %v173_v61 }
  0x98   :  { %965 = vmatpush1.bf16.msra.mxu1 %v1543_v29  ;;  %v1574_v29 = vld [vmem:[#allocation8 + $0x68] sm:$0xff]  }
  0x99   :  { %657 = vmatpush1.bf16.msra.mxu0 %v1449_v1  ;;  %966 = vmatprep.subr.bf16.mxu1 %v1548_v30  ;;  %v178_v1 = vrot.slane %v169_v62, %v177_v63  ;;  %v1575_v30 = vld [vmem:[#allocation8 + $0x28] sm:$0xff]  }
  0x9a   :  { %658 = vmatprep.subr.bf16.mxu0 %v1454_v3 }
  0x9c   :  { %967 = vmatpush1.bf16.msra.mxu1 %v1546_v33  ;;  %v1578_v33 = vld [vmem:[#allocation8 + $0x78] sm:$0xff]  }
  0x9d   :  { %659 = vmatpush1.bf16.msra.mxu0 %v1452_v7  ;;  %968 = vmatprep.subr.bf16.mxu1 %v1551_v34  ;;  %v1579_v34 = vld [vmem:[#allocation8 + $0x38] sm:$0xff]  }
  0x9e   :  { %660 = vmatprep.subr.bf16.mxu0 %v1457_v8 }
  0xa0   :  { %969 = vmatpush1.bf16.msra.mxu1 %v1549_v37 }
  0xa1   :  { %661 = vmatpush1.bf16.msra.mxu0 %v1455_v11  ;;  %970 = vmatprep.subr.bf16.mxu1 %v1554_v38 }
  0xa2   :  { %662 = vmatprep.subr.bf16.mxu0 %v1460_v12 }
  0xa4   :  { %971 = vmatpush1.bf16.msra.mxu1 %v1552_v41 }
  0xa5   :  { %663 = vmatpush1.bf16.msra.mxu0 %v1458_v15  ;;  %972 = vmatprep.subr.bf16.mxu1 %v1557_v48 }
  0xa6   :  { %664 = vmatprep.subr.bf16.mxu0 %v1463_v16 }
  0xa8   :  { %973 = vmatpush1.bf16.msra.mxu1 %v1555_v49 }
  0xa9   :  { %665 = vmatpush1.bf16.msra.mxu0 %v1461_v19  ;;  %974 = vmatprep.subr.bf16.mxu1 %v1560_v50 }
  0xaa   :  { %666 = vmatprep.subr.bf16.mxu0 %v1468_v20  ;;  %v1565_v20 = vld [vmem:[#allocation8] sm:$0xff]  }
  0xac   :  { %975 = vmatpush1.bf16.msra.mxu1 %v1558_v51 }
  0xad   :  { %667 = vmatpush1.bf16.msra.mxu0 %v1466_v23  ;;  %976 = vmatprep.subr.bf16.mxu1 %v1563_v52  ;;  %v1568_v23 = vld [vmem:[#allocation8 + $0x50] sm:$0xff]  }
  0xae   :  { %668 = vmatprep.subr.bf16.mxu0 %v1474_v24  ;;  %v1569_v24 = vld [vmem:[#allocation8 + $0x10] sm:$0xff]  }
  0xb0   :  { %977 = vmatpush1.bf16.msra.mxu1 %v1561_v53 }
  0xb1   :  { %669 = vmatpush1.bf16.msra.mxu0 %v1472_v27  ;;  %1343 = vmatprep.subr.bf16.mxu1 %v1564_v54  ;;  %v1572_v27 = vld [vmem:[#allocation8 + $0x60] sm:$0xff]  }
  0xb2   :  { %670 = vmatprep.subr.bf16.mxu0 %v1480_v28  ;;  %v1573_v28 = vld [vmem:[#allocation8 + $0x20] sm:$0xff]  }
  0xb5   :  { %671 = vmatpush1.bf16.msra.mxu0 %v1478_v31  ;;  %v1576_v31 = vld [vmem:[#allocation8 + $0x70] sm:$0xff]  }
  0xb6   :  { %672 = vmatprep.subr.bf16.mxu0 %v1486_v32  ;;  %v1577_v32 = vld [vmem:[#allocation8 + $0x30] sm:$0xff]  }
  0xb9   :  { %673 = vmatpush1.bf16.msra.mxu0 %v1484_v35  ;;  %v774_v35 = vld [vmem:[%s1842_s4] sm:$0x3] }
  0xba   :  { %674 = vmatprep.subr.bf16.mxu0 %v1492_v36  ;;  %v779_v36 = vrot.slane %v774_v35, %v173_v61  ;;  %v783_v37 = vrot.slane %v774_v35, %v177_v63 }
  0xbd   :  { %675 = vmatpush1.bf16.msra.mxu0 %v1490_v39 }
  0xbe   :  { %676 = vmatprep.subr.bf16.mxu0 %v1498_v40 }
  0xc1   :  { %677 = vmatpush1.bf16.msra.mxu0 %v1496_v42 }
  0xc2   :  { %678 = vmatprep.subr.bf16.mxu0 %v1504_v43 }
  0xc5   :  { %679 = vmatpush1.bf16.msra.mxu0 %v1502_v44 }
  0xc6   :  { %680 = vmatprep.subr.bf16.mxu0 %v1510_v45 }
  0xc9   :  { %681 = vmatpush1.bf16.msra.mxu0 %v1508_v46 }
  0xcc   :  { %683 = vmatmul.mubr.bf16.vlgmr.msra.gmra.mrb[0].mxu0 %v1512_v47 }
 0x146   :  { %v727_v55 = vpop.f32.mrb[0].mxu1 }
 0x147   :  { %v729_v56 = vpop.f32.mrb[1].mxu1 }
 0x148   :  { %v731_v57 = vpop.f32.mrb[2].mxu1 }
 0x149   :  { %v733_v58 = vpop.f32.mrb[3].mxu1 }
 0x19f   :  { %v684_v2 = vpop.f32.mrb[0].mxu0 }
 0x1a0   :  { %v1365_v3 = vadd.f32 %v684_v2, %v174_v0  ;;  %v686_v4 = vpop.f32.mrb[1].mxu0 }
 0x1a1   :  { %v1367_v5 = vadd.f32 %v686_v4, %v178_v1  ;;  %v688_v6 = vpop.f32.mrb[2].mxu0 }
 0x1a2   :  { %v1366_v7 = vadd.f32 %v1365_v3, %v727_v55  ;;  %v1369_v8 = vadd.f32 %v688_v6, %v174_v0  ;;  %v690_v9 = vpop.f32.mrb[3].mxu0 }
 0x1a3   :  { %v1368_v10 = vadd.f32 %v1367_v5, %v729_v56  ;;  %v1371_v11 = vadd.f32 %v690_v9, %v178_v1  ;;  %v1317_v56 = vld [vmem:[%s1844_s6] ss:$0 sm:$0xff] }
 0x1a4   :  { %v1370_v12 = vadd.f32 %v1369_v8, %v731_v57  ;;  %v736_v14 = vmax.f32 %v1366_v7, 0.0 }
 0x1a5   :  { %v1372_v13 = vadd.f32 %v1371_v11, %v733_v58  ;;  %v737_v16 = vmax.f32 %v1368_v10, 0.0 }
 0x1a6   :  { %v738_v15 = vmax.f32 %v1370_v12, 0.0 }
 0x1a7   :  { %v739_v17 = vmax.f32 %v1372_v13, 0.0 }
 0x1a8   :  { %v740_v18 = vpack.c.bf16 %v738_v15, %v736_v14 }
 0x1a9   :  { %v741_v19 = vpack.c.bf16 %v739_v17, %v737_v16 }
 0x1ab   :  { %978 = vmatprep.mubr.bf16.mxu1 %v741_v19 }
 0x1ac   :  { %979 = vmatmul.mubr.bf16.vlgmr.msra.gmra.mrb[4].mxu1 %v740_v18 }
 0x1ad   :  { %1344 = vmatpush3.bf16.msra.mxu1 %v1565_v20 }
 0x1ae   :  { %1345 = vmatprep.subr.bf16.mxu1 %v1566_v21 }
 0x1b1   :  { %1346 = vmatpush3.bf16.msra.mxu1 %v1567_v22 }
 0x1b2   :  { %1347 = vmatprep.subr.bf16.mxu1 %v1568_v23 }
 0x1b5   :  { %1348 = vmatpush3.bf16.msra.mxu1 %v1569_v24 }
 0x1b6   :  { %1349 = vmatprep.subr.bf16.mxu1 %v1570_v25 }
 0x1b9   :  { %1350 = vmatpush3.bf16.msra.mxu1 %v1571_v26 }
 0x1ba   :  { %1351 = vmatprep.subr.bf16.mxu1 %v1572_v27 }
 0x1bd   :  { %1352 = vmatpush3.bf16.msra.mxu1 %v1573_v28 }
 0x1be   :  { %1353 = vmatprep.subr.bf16.mxu1 %v1574_v29 }
 0x1c1   :  { %1354 = vmatpush3.bf16.msra.mxu1 %v1575_v30 }
 0x1c2   :  { %1355 = vmatprep.subr.bf16.mxu1 %v1576_v31 }
 0x1c5   :  { %1356 = vmatpush3.bf16.msra.mxu1 %v1577_v32 }
 0x1c6   :  { %1357 = vmatprep.subr.bf16.mxu1 %v1578_v33 }
 0x1c9   :  { %1358 = vmatpush3.bf16.msra.mxu1 %v1579_v34 }
 0x27f   :  { %v980_v38 = vpop.f32.mrb[4].mxu1 }
 0x280   :  { %v981_v39 = vadd.f32 %v980_v38, %v779_v36  ;;  %v982_v40 = vpop.f32.mrb[5].mxu1 }
 0x281   :  { %v983_v41 = vadd.f32 %v982_v40, %v783_v37  ;;  %v984_v42 = vpop.f32.mrb[6].mxu1 }
 0x282   :  { %v985_v43 = vadd.f32 %v984_v42, %v779_v36  ;;  %v986_v44 = vpop.f32.mrb[7].mxu1  ;;  %v989_v46 = vmax.f32 %v981_v39, 0.0 }
 0x283   :  { %v987_v45 = vadd.f32 %v986_v44, %v783_v37  ;;  %v990_v48 = vmax.f32 %v983_v41, 0.0 }
 0x284   :  { %v991_v47 = vmax.f32 %v985_v43, 0.0 }
 0x285   :  { %v992_v49 = vmax.f32 %v987_v45, 0.0 }
 0x286   :  { %v993_v50 = vpack.c.bf16 %v991_v47, %v989_v46 }
 0x287   :  { %v994_v51 = vpack.c.bf16 %v992_v49, %v990_v48 }
 0x289   :  { %1162 = vmatprep.mubr.bf16.mxu1 %v994_v51 }
 0x28a   :  { %1163 = vmatmul.mubr.bf16.vlgmr.msra.gmra.mrb[8].mxu1 %v993_v50 }
 0x35d   :  { %v1359_v52 = vpop.f32.mrb[8].mxu1 }
 0x35e   :  { %v1360_v53 = vpop.f32.mrb[9].mxu1 }
 0x35f   :  { %v1361_v54 = vadd.f32 %v1360_v53, %v1359_v52  ;;  %v1362_v55 = vpop.f32.mrb[10].mxu1 }
 0x360   :  { %v1363_v57 = vpop.f32.mrb[11].mxu1 }
 0x361   :  { %v1364_v58 = vadd.f32 %v1363_v57, %v1362_v55  ;;  %v1165_v59 = vadd.f32 %v1361_v54, %v1317_v56 }
 0x363   :  { %v1168_v60 = vadd.f32 %v1364_v58, %v1317_v56 }
 0x365   :  { %v1341_v61 = vpack.c.bf16 %v1168_v60, %v1165_v59 }
 0x367   :  { %1342 = vst [vmem:[#allocation10] sm:$0xff] %v1341_v61  }
 0x368   :  { %1679 = shalt.err (!%p1676_p8)
}
 0x369   :  { %s1680_s6 = scalar_lea.hbm %s1845_s7, 128 }
 0x36a   :  { %p1681_p9 = scmp.ne.s32.totalorder %s1845_s7, %s1680_s6  ;;  %p1684_p10 = scmp.lt.u32.totalorder %s1680_s6, %s1845_s7 }
 0x36c   :  { %p1686_p11 = pnand %p1684_p10, %p1681_p9 }
 0x36e   :  { %1689 = shalt.err (!%p1686_p11)
}
 0x36f   :  { %1192 = dma.vmem_to_hbm [thread:$0]  %s1187_s9, 128, %s1845_s7, [#allocation4], %s1706_s3, %s1706_s3, %s1707_s11  }
 0x370   :  { %1696 = dma.done.wait [#allocation4], 128  }
 0x371   :  { %1697 = vsyncadd [#allocation4], 4294967168 }
 0x372   :  { %1196 = vsyncpa [#allocation3], 1 }
 0x373   :  { %1197 = vsyncpa [#allocation6], 1 }
 0x374   :  { %1198 = vsyncpa [#allocation9], 1 }
 0x375   :  { %1199 = vsyncpa [#allocation4], 1 }

</bundles_post_ra>
